<compile_context>
chip_gen: v6e
topology: v6e:2x2x1
jax: 0.10.0
libtpu: 0.0.40
codegen_flags: <defaults>
</compile_context>

<pallas_src>
import functools

import jax
import jax.numpy as jnp
import numpy as np
from jax.experimental import pallas as pl
from jax.experimental.pallas import tpu as pltpu


def _self_attention_kernel(x_ref, wqkv_ref, wu_ref, bu_ref, mask_ref, o_ref, *,
                           heads, t, e, scale2, self_mask):
    """One grid step == one batch tile (bm batch elements).

    x_ref    : (bm*t, e)            activations (compute dtype)
    wqkv_ref : (e, 3*heads*e)       fused [Q|K|V] projection, (K, N) layout
    wu_ref   : (heads*e, e)         unifyheads weight, (K, N) layout
    bu_ref   : (1, e)               unifyheads bias (f32)
    mask_ref : (bm, heads, t, t)    int8 attention mask (keep where != 0)
    o_ref    : (bm*t, e)            output
    """
    bm = mask_ref.shape[0]
    he = heads * e

    # ---- fused QKV projection: single (bm*t, e) @ (e, 3*heads*e) MXU op ----
    qkv = jnp.dot(x_ref[...], wqkv_ref[...],
                  preferred_element_type=jnp.float32)        # (bm*t, 3*he) f32

    # ---- mask predicate, hoisted out of the per-head loop ----
    keep = mask_ref[...].astype(jnp.int32) != 0              # (bm, heads, t, t)
    if self_mask:
        row = jax.lax.broadcasted_iota(jnp.int32, (t, t), 0)
        col = jax.lax.broadcasted_iota(jnp.int32, (t, t), 1)
        causal_keep = col <= row                             # mask_diagonal=False

    rows = []
    for bb in range(bm):                                     # static, small
        r0 = bb * t
        heads_out = []
        for hh in range(heads):                              # static, small
            q = qkv[r0:r0 + t, hh * e:(hh + 1) * e]
            k = qkv[r0:r0 + t, he + hh * e:he + (hh + 1) * e]
            v = qkv[r0:r0 + t, 2 * he + hh * e:2 * he + (hh + 1) * e]

            # scores; e**-1/2 == (e**-1/4 on q) * (e**-1/4 on k)
            dot = jnp.einsum('tf,sf->ts', q, k,
                             preferred_element_type=jnp.float32) * scale2
            if self_mask:
                # replace semantics; large-negative instead of -inf (no NaN risk)
                dot = jnp.where(causal_keep, dot, jnp.float32(-1e30))
            # masked_fill(mask == 0, -1e9): exact replace semantics
            dot = jnp.where(keep[bb, hh], dot, jnp.float32(-1e9))

            # softmax over the key axis (f32); divide on the EUP
            dot = dot - jnp.max(dot, axis=1, keepdims=True)
            p = jnp.exp(dot)
            p = p * pl.reciprocal(jnp.sum(p, axis=1, keepdims=True), approx=True)

            heads_out.append(jnp.dot(p.astype(v.dtype), v,
                                     preferred_element_type=jnp.float32))
        rows.append(jnp.concatenate(heads_out, axis=1))      # (t, heads*e)

    out_cat = jnp.concatenate(rows, axis=0)                  # (bm*t, heads*e)

    # ---- unifyheads: single (bm*t, heads*e) @ (heads*e, e) MXU op + bias ----
    out = jnp.dot(out_cat.astype(wu_ref.dtype), wu_ref[...],
                  preferred_element_type=jnp.float32) + bu_ref[...]
    o_ref[...] = out.astype(o_ref.dtype)


def self_attention_pallas(x, params, mask=None, *, heads, self_mask=False,
                          batch_tile=None, compute_dtype=None):
    """Forward pass of UPDeT SelfAttention.

    batch_tile: batch elements per grid step. Default = whole batch (one grid
      step; best on single-TC v5e/v6e since the kernel is launch-overhead
      bound at these sizes). On v7x pass batch_tile = b // 2 (or smaller) to
      keep a parallel grid axis >= 2 so both TensorCores are used.
    compute_dtype: dtype fed to the MXU matmuls (e.g. jnp.bfloat16 on v6e/v7x);
      masking / softmax / accumulation stay in f32.
    """
    b, t, e = x.shape
    if batch_tile is None:
        batch_tile = b
    assert b % batch_tile == 0, "batch must be divisible by batch_tile"
    if compute_dtype is None:
        compute_dtype = x.dtype
    out_dtype = x.dtype
    he = heads * e

    Wq, Wk, Wv, Wu, bu = params
    # Fused, pre-transposed (K, N) projection weight: (e, 3*heads*e).
    # Column order: [Q_h0 .. Q_h{H-1} | K_h0 .. | V_h0 ..]  (head-major blocks).
    wqkv = jnp.concatenate([Wq.T, Wk.T, Wv.T], axis=1).astype(compute_dtype)
    # unifyheads weight in (K, N) form: (heads*e, e).
    wu_kn = Wu.T.astype(compute_dtype)
    bu2 = bu.reshape(1, e).astype(jnp.float32)

    # int8 mask (keep where != 0). O(t^2) input -> 4x fewer bytes than f32.
    # TODO(synk): for production-sized t, tile the key axis (or pass key
    # lengths via scalar prefetch) so mask/score buffering fits v7x's 64 MiB VMEM.
    if mask is None:
        mask_i8 = jnp.ones((b, heads, t, t), jnp.int8)
    else:
        mask_i8 = (jnp.asarray(mask).reshape(b, heads, t, t) != 0).astype(jnp.int8)

    # Fuse batch into M: all projections become one matmul with M = batch_tile*t.
    x2 = x.reshape(b * t, e).astype(compute_dtype)
    scale2 = float(e) ** -0.5          # (e**-0.25)**2 applied once to the scores

    kernel = functools.partial(_self_attention_kernel, heads=heads, t=t, e=e,
                               scale2=scale2, self_mask=self_mask)

    out2 = pl.pallas_call(
        kernel,
        out_shape=jax.ShapeDtypeStruct((b * t, e), out_dtype),
        grid_spec=pltpu.PrefetchScalarGridSpec(
            num_scalar_prefetch=0,
            grid=(b // batch_tile,),
            in_specs=[
                pl.BlockSpec((batch_tile * t, e), lambda i: (i, 0)),            # x
                pl.BlockSpec((e, 3 * he), lambda i: (0, 0)),                    # Wqkv
                pl.BlockSpec((he, e), lambda i: (0, 0)),                        # Wu
                pl.BlockSpec((1, e), lambda i: (0, 0)),                         # bu
                pl.BlockSpec((batch_tile, heads, t, t), lambda i: (i, 0, 0, 0)),# mask
            ],
            out_specs=pl.BlockSpec((batch_tile * t, e), lambda i: (i, 0)),
        ),
        compiler_params=pltpu.CompilerParams(
            dimension_semantics=("parallel",)),
    )(x2, wqkv, wu_kn, bu2, mask_i8)

    return out2.reshape(b, t, e)


def self_attention_reference(x, params, mask=None, *, heads, self_mask=False):
    """Pure-JAX mirror of the PyTorch forward for verification."""
    b, t, e = x.shape
    h = heads
    Wq, Wk, Wv, Wu, bu = params
    scale = float(e) ** 0.25

    def proj(W):
        y = x @ W.T                                        # (b, t, h*e)
        return y.reshape(b, t, h, e).transpose(0, 2, 1, 3).reshape(b * h, t, e)

    q = proj(Wq) / scale
    k = proj(Wk) / scale
    v = proj(Wv)
    dot = jnp.einsum('bte,bse->bts', q, k)                 # (b*h, t, t)
    if self_mask:
        row = jnp.arange(t)[:, None]
        col = jnp.arange(t)[None, :]
        dot = jnp.where(col > row, -jnp.inf, dot)
    if mask is not None:
        dot = jnp.where(jnp.asarray(mask).reshape(b * h, t, t) == 0, -1e9, dot)
    p = jax.nn.softmax(dot, axis=2)
    out = jnp.einsum('bts,bse->bte', p, v)
    out = out.reshape(b, h, t, e).transpose(0, 2, 1, 3).reshape(b, t, h * e)
    return out @ Wu.T + bu


if __name__ == "__main__":
    # small shapes consistent with the module (UPDeT-style): emb=32, heads=3
    b, t, e, heads = 2, 8, 32, 3

    key = jax.random.PRNGKey(0)
    kx, kq, kk, kv, ku, kb = jax.random.split(key, 6)

    x = jax.random.normal(kx, (b, t, e), jnp.float32)

    # deterministic parameter init (PyTorch Linear default: U(-1/sqrt(fan_in), +))
    bound_in = 1.0 / np.sqrt(e)
    bound_u = 1.0 / np.sqrt(heads * e)
    Wq = jax.random.uniform(kq, (heads * e, e), jnp.float32, -bound_in, bound_in)
    Wk = jax.random.uniform(kk, (heads * e, e), jnp.float32, -bound_in, bound_in)
    Wv = jax.random.uniform(kv, (heads * e, e), jnp.float32, -bound_in, bound_in)
    Wu = jax.random.uniform(ku, (e, heads * e), jnp.float32, -bound_u, bound_u)
    bu = jax.random.uniform(kb, (e,), jnp.float32, -bound_u, bound_u)
    params = (Wq, Wk, Wv, Wu, bu)

    # attention mask (== the `mask` forward arg): mask out the last 2 keys for batch 1
    mask = jnp.ones((b, heads, t, t), jnp.float32)
    mask = mask.at[1, :, :, t - 2:].set(0.0)

    ref = self_attention_reference(x, params, mask, heads=heads, self_mask=False)

    # 1) default: whole batch in one grid step, f32 compute (v5e/v6e sweet spot)
    out = self_attention_pallas(x, params, mask, heads=heads, self_mask=False)
    out = jax.block_until_ready(out)
    np.testing.assert_allclose(np.asarray(out), np.asarray(ref),
                               rtol=2e-3, atol=2e-3)

    # 2) parallel grid of 2 steps (keeps both v7x TensorCores busy)
    out_p = self_attention_pallas(x, params, mask, heads=heads, self_mask=False,
                                  batch_tile=1)
    out_p = jax.block_until_ready(out_p)
    np.testing.assert_allclose(np.asarray(out_p), np.asarray(ref),
                               rtol=2e-3, atol=2e-3)

    # 3) bf16 MXU path (v6e/v7x); softmax still f32 -> loose tolerance vs f32 ref
    out_bf = self_attention_pallas(x, params, mask, heads=heads, self_mask=False,
                                   compute_dtype=jnp.bfloat16)
    out_bf = jax.block_until_ready(out_bf)
    np.testing.assert_allclose(np.asarray(out_bf), np.asarray(ref),
                               rtol=5e-2, atol=5e-2)

    print("KERNEL_OK")
</pallas_src>

<mosaic_0001>
module attributes {stable_mosaic.version = 11 : i64} {
  func.func @_self_attention_kernel(%arg0: i32, %arg1: memref<16x32xf32, #tpu.memory_space<vmem>>, %arg2: memref<32x288xf32, #tpu.memory_space<vmem>>, %arg3: memref<96x32xf32, #tpu.memory_space<vmem>>, %arg4: memref<1x32xf32, #tpu.memory_space<vmem>>, %arg5: memref<2x3x8x8xi8, #tpu.memory_space<vmem>>, %arg6: memref<16x32xf32, #tpu.memory_space<vmem>>) attributes {dimension_semantics = [#tpu.dimension_semantics<parallel>], iteration_bounds = array<i64: 1>, scalar_prefetch = 0 : i64, scratch_operands = 0 : i64, tpu.core_type = #tpu.core_type<tc>, window_params = [{transform_indices = @transform_0, window_bounds = array<i64: 16, 32>}, {pipeline_mode = #tpu.pipeline_mode<synchronous>, transform_indices = @transform_1, window_bounds = array<i64: 32, 288>}, {pipeline_mode = #tpu.pipeline_mode<synchronous>, transform_indices = @transform_2, window_bounds = array<i64: 96, 32>}, {pipeline_mode = #tpu.pipeline_mode<synchronous>, transform_indices = @transform_3, window_bounds = array<i64: 1, 32>}, {transform_indices = @transform_4, window_bounds = array<i64: 2, 3, 8, 8>}, {transform_indices = @transform_5, window_bounds = array<i64: 16, 32>}]} {
    %c0 = arith.constant 0 : index
    %c0_0 = arith.constant 0 : index
    %0 = vector.load %arg1[%c0, %c0_0] : memref<16x32xf32, #tpu.memory_space<vmem>>, vector<16x32xf32>
    %c0_1 = arith.constant 0 : index
    %c0_2 = arith.constant 0 : index
    %1 = vector.load %arg2[%c0_1, %c0_2] : memref<32x288xf32, #tpu.memory_space<vmem>>, vector<32x288xf32>
    %cst = arith.constant dense<0.000000e+00> : vector<16x288xf32>
    %2 = tpu.matmul %0, %1, %cst {dimension_numbers = #tpu.dot_dimension_numbers<[1], [0], [0], [1], [0, 0, 1, 1], [], []>} : vector<16x32xf32>, vector<32x288xf32>, vector<16x288xf32> -> vector<16x288xf32>
    %c0_3 = arith.constant 0 : index
    %c0_4 = arith.constant 0 : index
    %c0_5 = arith.constant 0 : index
    %c0_6 = arith.constant 0 : index
    %3 = vector.load %arg5[%c0_3, %c0_4, %c0_5, %c0_6] : memref<2x3x8x8xi8, #tpu.memory_space<vmem>>, vector<2x3x8x8xi8>
    %4 = arith.extsi %3 : vector<2x3x8x8xi8> to vector<2x3x8x8xi32>
    %c0_i32 = arith.constant 0 : i32
    %5 = vector.broadcast %c0_i32 : i32 to vector<2x3x8x8xi32>
    %6 = arith.cmpi ne, %4, %5 : vector<2x3x8x8xi32>
    %7 = vector.extract_strided_slice %2 {offsets = [0, 0], sizes = [8, 32], strides = [1, 1]} : vector<16x288xf32> to vector<8x32xf32>
    %8 = vector.extract_strided_slice %2 {offsets = [0, 96], sizes = [8, 32], strides = [1, 1]} : vector<16x288xf32> to vector<8x32xf32>
    %9 = vector.extract_strided_slice %2 {offsets = [0, 192], sizes = [8, 32], strides = [1, 1]} : vector<16x288xf32> to vector<8x32xf32>
    "tpu.trace_start"() <{level = 10 : i32, message = "tf,sf->ts"}> : () -> ()
    %cst_7 = arith.constant dense<0.000000e+00> : vector<8x8xf32>
    %10 = tpu.matmul %7, %8, %cst_7 {dimension_numbers = #tpu.dot_dimension_numbers<[1], [1], [0], [0], [0, 0, 1, 0], [], []>} : vector<8x32xf32>, vector<8x32xf32>, vector<8x8xf32> -> vector<8x8xf32>
    "tpu.trace_stop"() : () -> ()
    %cst_8 = arith.constant 0.176776692 : f32
    %11 = vector.broadcast %cst_8 : f32 to vector<8x8xf32>
    %12 = arith.mulf %10, %11 : vector<8x8xf32>
    %13 = vector.extract_strided_slice %6 {offsets = [0, 0, 0, 0], sizes = [1, 1, 8, 8], strides = [1, 1, 1, 1]} : vector<2x3x8x8xi1> to vector<1x1x8x8xi1>
    %14 = vector.shape_cast %13 : vector<1x1x8x8xi1> to vector<8x8xi1>
    %cst_9 = arith.constant -1.000000e+09 : f32
    %15 = vector.broadcast %cst_9 : f32 to vector<8x8xf32>
    %16 = arith.select %14, %12, %15 : vector<8x8xi1>, vector<8x8xf32>
    %cst_10 = arith.constant dense<0xFF800000> : vector<8xf32>
    %17 = vector.multi_reduction <maximumf>, %16, %cst_10 [1] : vector<8x8xf32> to vector<8xf32>
    %18 = vector.shape_cast %17 : vector<8xf32> to vector<8x1xf32>
    %19 = vector.broadcast %18 : vector<8x1xf32> to vector<8x8xf32>
    %20 = arith.subf %16, %19 : vector<8x8xf32>
    %21 = math.exp %20 : vector<8x8xf32>
    %cst_11 = arith.constant dense<0.000000e+00> : vector<8xf32>
    %22 = vector.multi_reduction <add>, %21, %cst_11 [1] : vector<8x8xf32> to vector<8xf32>
    %23 = vector.shape_cast %22 : vector<8xf32> to vector<8x1xf32>
    %24 = tpu.reciprocal %23 {approx = true} : vector<8x1xf32> -> vector<8x1xf32>
    %25 = vector.broadcast %24 : vector<8x1xf32> to vector<8x8xf32>
    %26 = arith.mulf %21, %25 : vector<8x8xf32>
    %cst_12 = arith.constant dense<0.000000e+00> : vector<8x32xf32>
    %27 = tpu.matmul %26, %9, %cst_12 {dimension_numbers = #tpu.dot_dimension_numbers<[1], [0], [0], [1], [0, 0, 1, 1], [], []>} : vector<8x8xf32>, vector<8x32xf32>, vector<8x32xf32> -> vector<8x32xf32>
    %28 = vector.extract_strided_slice %2 {offsets = [0, 32], sizes = [8, 32], strides = [1, 1]} : vector<16x288xf32> to vector<8x32xf32>
    %29 = vector.extract_strided_slice %2 {offsets = [0, 128], sizes = [8, 32], strides = [1, 1]} : vector<16x288xf32> to vector<8x32xf32>
    %30 = vector.extract_strided_slice %2 {offsets = [0, 224], sizes = [8, 32], strides = [1, 1]} : vector<16x288xf32> to vector<8x32xf32>
    "tpu.trace_start"() <{level = 10 : i32, message = "tf,sf->ts"}> : () -> ()
    %cst_13 = arith.constant dense<0.000000e+00> : vector<8x8xf32>
    %31 = tpu.matmul %28, %29, %cst_13 {dimension_numbers = #tpu.dot_dimension_numbers<[1], [1], [0], [0], [0, 0, 1, 0], [], []>} : vector<8x32xf32>, vector<8x32xf32>, vector<8x8xf32> -> vector<8x8xf32>
    "tpu.trace_stop"() : () -> ()
    %cst_14 = arith.constant 0.176776692 : f32
    %32 = vector.broadcast %cst_14 : f32 to vector<8x8xf32>
    %33 = arith.mulf %31, %32 : vector<8x8xf32>
    %34 = vector.extract_strided_slice %6 {offsets = [0, 1, 0, 0], sizes = [1, 1, 8, 8], strides = [1, 1, 1, 1]} : vector<2x3x8x8xi1> to vector<1x1x8x8xi1>
    %35 = vector.shape_cast %34 : vector<1x1x8x8xi1> to vector<8x8xi1>
    %cst_15 = arith.constant -1.000000e+09 : f32
    %36 = vector.broadcast %cst_15 : f32 to vector<8x8xf32>
    %37 = arith.select %35, %33, %36 : vector<8x8xi1>, vector<8x8xf32>
    %cst_16 = arith.constant dense<0xFF800000> : vector<8xf32>
    %38 = vector.multi_reduction <maximumf>, %37, %cst_16 [1] : vector<8x8xf32> to vector<8xf32>
    %39 = vector.shape_cast %38 : vector<8xf32> to vector<8x1xf32>
    %40 = vector.broadcast %39 : vector<8x1xf32> to vector<8x8xf32>
    %41 = arith.subf %37, %40 : vector<8x8xf32>
    %42 = math.exp %41 : vector<8x8xf32>
    %cst_17 = arith.constant dense<0.000000e+00> : vector<8xf32>
    %43 = vector.multi_reduction <add>, %42, %cst_17 [1] : vector<8x8xf32> to vector<8xf32>
    %44 = vector.shape_cast %43 : vector<8xf32> to vector<8x1xf32>
    %45 = tpu.reciprocal %44 {approx = true} : vector<8x1xf32> -> vector<8x1xf32>
    %46 = vector.broadcast %45 : vector<8x1xf32> to vector<8x8xf32>
    %47 = arith.mulf %42, %46 : vector<8x8xf32>
    %cst_18 = arith.constant dense<0.000000e+00> : vector<8x32xf32>
    %48 = tpu.matmul %47, %30, %cst_18 {dimension_numbers = #tpu.dot_dimension_numbers<[1], [0], [0], [1], [0, 0, 1, 1], [], []>} : vector<8x8xf32>, vector<8x32xf32>, vector<8x32xf32> -> vector<8x32xf32>
    %49 = vector.extract_strided_slice %2 {offsets = [0, 64], sizes = [8, 32], strides = [1, 1]} : vector<16x288xf32> to vector<8x32xf32>
    %50 = vector.extract_strided_slice %2 {offsets = [0, 160], sizes = [8, 32], strides = [1, 1]} : vector<16x288xf32> to vector<8x32xf32>
    %51 = vector.extract_strided_slice %2 {offsets = [0, 256], sizes = [8, 32], strides = [1, 1]} : vector<16x288xf32> to vector<8x32xf32>
    "tpu.trace_start"() <{level = 10 : i32, message = "tf,sf->ts"}> : () -> ()
    %cst_19 = arith.constant dense<0.000000e+00> : vector<8x8xf32>
    %52 = tpu.matmul %49, %50, %cst_19 {dimension_numbers = #tpu.dot_dimension_numbers<[1], [1], [0], [0], [0, 0, 1, 0], [], []>} : vector<8x32xf32>, vector<8x32xf32>, vector<8x8xf32> -> vector<8x8xf32>
    "tpu.trace_stop"() : () -> ()
    %cst_20 = arith.constant 0.176776692 : f32
    %53 = vector.broadcast %cst_20 : f32 to vector<8x8xf32>
    %54 = arith.mulf %52, %53 : vector<8x8xf32>
    %55 = vector.extract_strided_slice %6 {offsets = [0, 2, 0, 0], sizes = [1, 1, 8, 8], strides = [1, 1, 1, 1]} : vector<2x3x8x8xi1> to vector<1x1x8x8xi1>
    %56 = vector.shape_cast %55 : vector<1x1x8x8xi1> to vector<8x8xi1>
    %cst_21 = arith.constant -1.000000e+09 : f32
    %57 = vector.broadcast %cst_21 : f32 to vector<8x8xf32>
    %58 = arith.select %56, %54, %57 : vector<8x8xi1>, vector<8x8xf32>
    %cst_22 = arith.constant dense<0xFF800000> : vector<8xf32>
    %59 = vector.multi_reduction <maximumf>, %58, %cst_22 [1] : vector<8x8xf32> to vector<8xf32>
    %60 = vector.shape_cast %59 : vector<8xf32> to vector<8x1xf32>
    %61 = vector.broadcast %60 : vector<8x1xf32> to vector<8x8xf32>
    %62 = arith.subf %58, %61 : vector<8x8xf32>
    %63 = math.exp %62 : vector<8x8xf32>
    %cst_23 = arith.constant dense<0.000000e+00> : vector<8xf32>
    %64 = vector.multi_reduction <add>, %63, %cst_23 [1] : vector<8x8xf32> to vector<8xf32>
    %65 = vector.shape_cast %64 : vector<8xf32> to vector<8x1xf32>
    %66 = tpu.reciprocal %65 {approx = true} : vector<8x1xf32> -> vector<8x1xf32>
    %67 = vector.broadcast %66 : vector<8x1xf32> to vector<8x8xf32>
    %68 = arith.mulf %63, %67 : vector<8x8xf32>
    %cst_24 = arith.constant dense<0.000000e+00> : vector<8x32xf32>
    %69 = tpu.matmul %68, %51, %cst_24 {dimension_numbers = #tpu.dot_dimension_numbers<[1], [0], [0], [1], [0, 0, 1, 1], [], []>} : vector<8x8xf32>, vector<8x32xf32>, vector<8x32xf32> -> vector<8x32xf32>
    %70 = tpu.concatenate %27, %48, %69 in 1 : vector<8x32xf32>, vector<8x32xf32>, vector<8x32xf32> -> vector<8x96xf32>
    %71 = vector.extract_strided_slice %2 {offsets = [8, 0], sizes = [8, 32], strides = [1, 1]} : vector<16x288xf32> to vector<8x32xf32>
    %72 = vector.extract_strided_slice %2 {offsets = [8, 96], sizes = [8, 32], strides = [1, 1]} : vector<16x288xf32> to vector<8x32xf32>
    %73 = vector.extract_strided_slice %2 {offsets = [8, 192], sizes = [8, 32], strides = [1, 1]} : vector<16x288xf32> to vector<8x32xf32>
    "tpu.trace_start"() <{level = 10 : i32, message = "tf,sf->ts"}> : () -> ()
    %cst_25 = arith.constant dense<0.000000e+00> : vector<8x8xf32>
    %74 = tpu.matmul %71, %72, %cst_25 {dimension_numbers = #tpu.dot_dimension_numbers<[1], [1], [0], [0], [0, 0, 1, 0], [], []>} : vector<8x32xf32>, vector<8x32xf32>, vector<8x8xf32> -> vector<8x8xf32>
    "tpu.trace_stop"() : () -> ()
    %cst_26 = arith.constant 0.176776692 : f32
    %75 = vector.broadcast %cst_26 : f32 to vector<8x8xf32>
    %76 = arith.mulf %74, %75 : vector<8x8xf32>
    %77 = vector.extract_strided_slice %6 {offsets = [1, 0, 0, 0], sizes = [1, 1, 8, 8], strides = [1, 1, 1, 1]} : vector<2x3x8x8xi1> to vector<1x1x8x8xi1>
    %78 = vector.shape_cast %77 : vector<1x1x8x8xi1> to vector<8x8xi1>
    %cst_27 = arith.constant -1.000000e+09 : f32
    %79 = vector.broadcast %cst_27 : f32 to vector<8x8xf32>
    %80 = arith.select %78, %76, %79 : vector<8x8xi1>, vector<8x8xf32>
    %cst_28 = arith.constant dense<0xFF800000> : vector<8xf32>
    %81 = vector.multi_reduction <maximumf>, %80, %cst_28 [1] : vector<8x8xf32> to vector<8xf32>
    %82 = vector.shape_cast %81 : vector<8xf32> to vector<8x1xf32>
    %83 = vector.broadcast %82 : vector<8x1xf32> to vector<8x8xf32>
    %84 = arith.subf %80, %83 : vector<8x8xf32>
    %85 = math.exp %84 : vector<8x8xf32>
    %cst_29 = arith.constant dense<0.000000e+00> : vector<8xf32>
    %86 = vector.multi_reduction <add>, %85, %cst_29 [1] : vector<8x8xf32> to vector<8xf32>
    %87 = vector.shape_cast %86 : vector<8xf32> to vector<8x1xf32>
    %88 = tpu.reciprocal %87 {approx = true} : vector<8x1xf32> -> vector<8x1xf32>
    %89 = vector.broadcast %88 : vector<8x1xf32> to vector<8x8xf32>
    %90 = arith.mulf %85, %89 : vector<8x8xf32>
    %cst_30 = arith.constant dense<0.000000e+00> : vector<8x32xf32>
    %91 = tpu.matmul %90, %73, %cst_30 {dimension_numbers = #tpu.dot_dimension_numbers<[1], [0], [0], [1], [0, 0, 1, 1], [], []>} : vector<8x8xf32>, vector<8x32xf32>, vector<8x32xf32> -> vector<8x32xf32>
    %92 = vector.extract_strided_slice %2 {offsets = [8, 32], sizes = [8, 32], strides = [1, 1]} : vector<16x288xf32> to vector<8x32xf32>
    %93 = vector.extract_strided_slice %2 {offsets = [8, 128], sizes = [8, 32], strides = [1, 1]} : vector<16x288xf32> to vector<8x32xf32>
    %94 = vector.extract_strided_slice %2 {offsets = [8, 224], sizes = [8, 32], strides = [1, 1]} : vector<16x288xf32> to vector<8x32xf32>
    "tpu.trace_start"() <{level = 10 : i32, message = "tf,sf->ts"}> : () -> ()
    %cst_31 = arith.constant dense<0.000000e+00> : vector<8x8xf32>
    %95 = tpu.matmul %92, %93, %cst_31 {dimension_numbers = #tpu.dot_dimension_numbers<[1], [1], [0], [0], [0, 0, 1, 0], [], []>} : vector<8x32xf32>, vector<8x32xf32>, vector<8x8xf32> -> vector<8x8xf32>
    "tpu.trace_stop"() : () -> ()
    %cst_32 = arith.constant 0.176776692 : f32
    %96 = vector.broadcast %cst_32 : f32 to vector<8x8xf32>
    %97 = arith.mulf %95, %96 : vector<8x8xf32>
    %98 = vector.extract_strided_slice %6 {offsets = [1, 1, 0, 0], sizes = [1, 1, 8, 8], strides = [1, 1, 1, 1]} : vector<2x3x8x8xi1> to vector<1x1x8x8xi1>
    %99 = vector.shape_cast %98 : vector<1x1x8x8xi1> to vector<8x8xi1>
    %cst_33 = arith.constant -1.000000e+09 : f32
    %100 = vector.broadcast %cst_33 : f32 to vector<8x8xf32>
    %101 = arith.select %99, %97, %100 : vector<8x8xi1>, vector<8x8xf32>
    %cst_34 = arith.constant dense<0xFF800000> : vector<8xf32>
    %102 = vector.multi_reduction <maximumf>, %101, %cst_34 [1] : vector<8x8xf32> to vector<8xf32>
    %103 = vector.shape_cast %102 : vector<8xf32> to vector<8x1xf32>
    %104 = vector.broadcast %103 : vector<8x1xf32> to vector<8x8xf32>
    %105 = arith.subf %101, %104 : vector<8x8xf32>
    %106 = math.exp %105 : vector<8x8xf32>
    %cst_35 = arith.constant dense<0.000000e+00> : vector<8xf32>
    %107 = vector.multi_reduction <add>, %106, %cst_35 [1] : vector<8x8xf32> to vector<8xf32>
    %108 = vector.shape_cast %107 : vector<8xf32> to vector<8x1xf32>
    %109 = tpu.reciprocal %108 {approx = true} : vector<8x1xf32> -> vector<8x1xf32>
    %110 = vector.broadcast %109 : vector<8x1xf32> to vector<8x8xf32>
    %111 = arith.mulf %106, %110 : vector<8x8xf32>
    %cst_36 = arith.constant dense<0.000000e+00> : vector<8x32xf32>
    %112 = tpu.matmul %111, %94, %cst_36 {dimension_numbers = #tpu.dot_dimension_numbers<[1], [0], [0], [1], [0, 0, 1, 1], [], []>} : vector<8x8xf32>, vector<8x32xf32>, vector<8x32xf32> -> vector<8x32xf32>
    %113 = vector.extract_strided_slice %2 {offsets = [8, 64], sizes = [8, 32], strides = [1, 1]} : vector<16x288xf32> to vector<8x32xf32>
    %114 = vector.extract_strided_slice %2 {offsets = [8, 160], sizes = [8, 32], strides = [1, 1]} : vector<16x288xf32> to vector<8x32xf32>
    %115 = vector.extract_strided_slice %2 {offsets = [8, 256], sizes = [8, 32], strides = [1, 1]} : vector<16x288xf32> to vector<8x32xf32>
    "tpu.trace_start"() <{level = 10 : i32, message = "tf,sf->ts"}> : () -> ()
    %cst_37 = arith.constant dense<0.000000e+00> : vector<8x8xf32>
    %116 = tpu.matmul %113, %114, %cst_37 {dimension_numbers = #tpu.dot_dimension_numbers<[1], [1], [0], [0], [0, 0, 1, 0], [], []>} : vector<8x32xf32>, vector<8x32xf32>, vector<8x8xf32> -> vector<8x8xf32>
    "tpu.trace_stop"() : () -> ()
    %cst_38 = arith.constant 0.176776692 : f32
    %117 = vector.broadcast %cst_38 : f32 to vector<8x8xf32>
    %118 = arith.mulf %116, %117 : vector<8x8xf32>
    %119 = vector.extract_strided_slice %6 {offsets = [1, 2, 0, 0], sizes = [1, 1, 8, 8], strides = [1, 1, 1, 1]} : vector<2x3x8x8xi1> to vector<1x1x8x8xi1>
    %120 = vector.shape_cast %119 : vector<1x1x8x8xi1> to vector<8x8xi1>
    %cst_39 = arith.constant -1.000000e+09 : f32
    %121 = vector.broadcast %cst_39 : f32 to vector<8x8xf32>
    %122 = arith.select %120, %118, %121 : vector<8x8xi1>, vector<8x8xf32>
    %cst_40 = arith.constant dense<0xFF800000> : vector<8xf32>
    %123 = vector.multi_reduction <maximumf>, %122, %cst_40 [1] : vector<8x8xf32> to vector<8xf32>
    %124 = vector.shape_cast %123 : vector<8xf32> to vector<8x1xf32>
    %125 = vector.broadcast %124 : vector<8x1xf32> to vector<8x8xf32>
    %126 = arith.subf %122, %125 : vector<8x8xf32>
    %127 = math.exp %126 : vector<8x8xf32>
    %cst_41 = arith.constant dense<0.000000e+00> : vector<8xf32>
    %128 = vector.multi_reduction <add>, %127, %cst_41 [1] : vector<8x8xf32> to vector<8xf32>
    %129 = vector.shape_cast %128 : vector<8xf32> to vector<8x1xf32>
    %130 = tpu.reciprocal %129 {approx = true} : vector<8x1xf32> -> vector<8x1xf32>
    %131 = vector.broadcast %130 : vector<8x1xf32> to vector<8x8xf32>
    %132 = arith.mulf %127, %131 : vector<8x8xf32>
    %cst_42 = arith.constant dense<0.000000e+00> : vector<8x32xf32>
    %133 = tpu.matmul %132, %115, %cst_42 {dimension_numbers = #tpu.dot_dimension_numbers<[1], [0], [0], [1], [0, 0, 1, 1], [], []>} : vector<8x8xf32>, vector<8x32xf32>, vector<8x32xf32> -> vector<8x32xf32>
    %134 = tpu.concatenate %91, %112, %133 in 1 : vector<8x32xf32>, vector<8x32xf32>, vector<8x32xf32> -> vector<8x96xf32>
    %135 = tpu.concatenate %70, %134 in 0 : vector<8x96xf32>, vector<8x96xf32> -> vector<16x96xf32>
    %c0_43 = arith.constant 0 : index
    %c0_44 = arith.constant 0 : index
    %136 = vector.load %arg3[%c0_43, %c0_44] : memref<96x32xf32, #tpu.memory_space<vmem>>, vector<96x32xf32>
    %cst_45 = arith.constant dense<0.000000e+00> : vector<16x32xf32>
    %137 = tpu.matmul %135, %136, %cst_45 {dimension_numbers = #tpu.dot_dimension_numbers<[1], [0], [0], [1], [0, 0, 1, 1], [], []>} : vector<16x96xf32>, vector<96x32xf32>, vector<16x32xf32> -> vector<16x32xf32>
    %c0_46 = arith.constant 0 : index
    %c0_47 = arith.constant 0 : index
    %138 = vector.load %arg4[%c0_46, %c0_47] : memref<1x32xf32, #tpu.memory_space<vmem>>, vector<1x32xf32>
    %139 = vector.broadcast %138 : vector<1x32xf32> to vector<16x32xf32>
    %140 = arith.addf %137, %139 : vector<16x32xf32>
    %c0_48 = arith.constant 0 : index
    %c0_49 = arith.constant 0 : index
    %141 = vector.load %arg6[%c0_48, %c0_49] : memref<16x32xf32, #tpu.memory_space<vmem>>, vector<16x32xf32>
    tpu.vector_store %arg6[%c0_48, %c0_49], %140 {strides = array<i32>} : memref<16x32xf32, #tpu.memory_space<vmem>>, vector<16x32xf32>,
    return
  }
  func.func @transform_0(%arg0: i32) -> (i32, i32) {
    %c0_i32 = arith.constant 0 : i32
    %c0_i32_0 = arith.constant 0 : i32
    return %arg0, %c0_i32 : i32, i32
  }
  func.func @transform_1(%arg0: i32) -> (i32, i32) {
    %c0_i32 = arith.constant 0 : i32
    %c0_i32_0 = arith.constant 0 : i32
    %c0_i32_1 = arith.constant 0 : i32
    return %c0_i32, %c0_i32_0 : i32, i32
  }
  func.func @transform_2(%arg0: i32) -> (i32, i32) {
    %c0_i32 = arith.constant 0 : i32
    %c0_i32_0 = arith.constant 0 : i32
    %c0_i32_1 = arith.constant 0 : i32
    return %c0_i32, %c0_i32_0 : i32, i32
  }
  func.func @transform_3(%arg0: i32) -> (i32, i32) {
    %c0_i32 = arith.constant 0 : i32
    %c0_i32_0 = arith.constant 0 : i32
    %c0_i32_1 = arith.constant 0 : i32
    return %c0_i32, %c0_i32_0 : i32, i32
  }
  func.func @transform_4(%arg0: i32) -> (i32, i32, i32, i32) {
    %c0_i32 = arith.constant 0 : i32
    %c0_i32_0 = arith.constant 0 : i32
    %c0_i32_1 = arith.constant 0 : i32
    %c0_i32_2 = arith.constant 0 : i32
    return %arg0, %c0_i32, %c0_i32_0, %c0_i32_1 : i32, i32, i32, i32
  }
  func.func @transform_5(%arg0: i32) -> (i32, i32) {
    %c0_i32 = arith.constant 0 : i32
    %c0_i32_0 = arith.constant 0 : i32
    return %arg0, %c0_i32 : i32, i32
  }
}

</mosaic_0001>

<bundles_post_ra>
// kernel: tpu_custom_call.1
= control target key start
LH: loop header
LB: loop body
LE: loop exit
PB: predicated region body
PF: predicated region fallthrough
CT: control target
= control target key end

     0   :  { %v1580_v4 = vmov 0.0   ;;  %s1814_s0 = inlined_call_operand.vmem [shape: f32[16,32], index: 0, kind: input, shape index: {}]   ;;  %s1815_s1 = inlined_call_operand.vmem [shape: f32[32,288], index: 1, kind: input, shape index: {}]   ;;  %s1816_s2 = inlined_call_operand.vmem [shape: f32[96,32], index: 2, kind: input, shape index: {}]   ;;  %s1817_s3 = inlined_call_operand.vmem [shape: f32[1,32], index: 3, kind: input, shape index: {}]   ;;  %s1818_s4 = inlined_call_operand.vmem [shape: s8[2,3,8,8], index: 4, kind: input, shape index: {}]   ;;  %s1819_s5 = inlined_call_operand.hbm [shape: f32[16,32], index: 5, kind: output, shape index: {}]  }
   0x1   :  { %v33_v0 = vld [vmem:[%s1815_s1 + $0x50] sm:$0xff]  ;;  %v32_v1 = vld [vmem:[%s1815_s1 + $0x48] sm:$0xff]  ;;  %v30_v2 = vld [vmem:[%s1815_s1 + $0x38] sm:$0xff]  ;;  %106 = vmatprep.mubr.f32.mxu0 %v1580_v4  ;;  %1447 = vmatprep.subr.mxu1 %v1580_v4 }
   0x2   :  { %66 = vmatprep.subr.mxu0 %v33_v0  ;;  %v29_v3 = vld [vmem:[%s1815_s1 + $0x30] sm:$0xff]  ;;  %v27_v5 = vld [vmem:[%s1815_s1 + $0x20] sm:$0xff]  ;;  %v26_v6 = vld [vmem:[%s1815_s1 + $0x18] sm:$0xff] }
   0x3   :  { %67 = vmatpush1.msra.mxu0 %v32_v1 }
   0x4   :  { %68 = vmatprep.subr.mxu0 %v30_v2 }
   0x5   :  { %10 = vsyncpa [#allocation3], 0  ;;  %69 = vmatpush1.msra.mxu0 %v29_v3  ;;  %v24_v7 = vld [vmem:[%s1815_s1 + $0x8] sm:$0xff]  ;;  %v23_v8 = vld [vmem:[%s1815_s1] sm:$0xff]  ;;  %vm35_vm0 = vcmask 261120   ;;  %vm1581_vm1 = vmmov 0  }
   0x6   :  { %70 = vmatprep.subr.mxu0 %v27_v5  ;;  %v21_v9 = vld [vmem:[%s1814_s0] sm:$0xff]  ;;  %v22_v10 = vld [vmem:[%s1814_s0 + $0x8] sm:$0xff]  ;;  %v34_v11 = vld [vmem:[%s1815_s1 + $0x58] sm:$0xff]  ;;  %1449 = vmatprep.mubr.msk.f32.mxu1 %vm1581_vm1, %v1580_v4  ;;  %s1582_s20 = smov 32   ;;  %s1584_s21 = smov 64   ;;  %vm291_vm3 = vcmask 64512  }
   0x7   :  { %71 = vmatpush1.msra.mxu0 %v26_v6  ;;  %v31_v12 = vld [vmem:[%s1815_s1 + $0x40] sm:$0xff]  ;;  %v28_v13 = vld [vmem:[%s1815_s1 + $0x28] sm:$0xff]  ;;  %v25_v14 = vld [vmem:[%s1815_s1 + $0x10] sm:$0xff]  ;;  %s1583_s1 = smov 96   ;;  %vm718_vm9 = vcmask 523264   ;;  %vm1245_vm10 = vcmask 785408  }
   0x8   :  { %72 = vmatprep.subr.mxu0 %v24_v7  ;;  %v1371_v28 = vld [vmem:[%s1818_s4] sm:$0xff]   ;;  %v1525_v46 = vld [vmem:[%s1818_s4 + $0x8] sm:$0xf]  }
   0x9   :  { %73 = vmatpush1.msra.mxu0 %v23_v8  ;;  %v1372_v30 = vunpack.c.0.s8 %v1371_v28  ;;  %v1373_v31 = vunpack.c.1.s8 %v1371_v28  ;;  %v1376_v35 = vunpack.c.2.s8 %v1371_v28  ;;  %v1377_v44 = vunpack.c.3.s8 %v1371_v28 }
   0xa   :  { %1345 = vmatmul.mubr.msk.f32.vlgmr.msra.gmra.mxu0 %vm35_vm0, %v21_v9  ;;  %1426 = vmatprep.subr.mxu0 %v34_v11  ;;  %v1380_v51 = vunpack.c.0.s8 %v1525_v46  ;;  %v1381_v57 = vunpack.c.1.s8 %v1525_v46 }
   0xb   :  { %112 = vmatprep.mubr.f32.mxu0 %v1580_v4  ;;  %1427 = vmatpush3.msra.mxu0 %v34_v11  ;;  %vm206_vm2 = vcmp.ne.s32.totalorder %v1372_v30, 0  ;;  %vm207_vm4 = vcmp.ne.s32.totalorder %v1373_v31, 0  ;;  %vm208_vm5 = vcmp.ne.s32.totalorder %v1376_v35, 0  ;;  %vm209_vm6 = vcmp.ne.s32.totalorder %v1377_v44, 0 }
   0xc   :  { %1428 = vmatprep.subr.mxu0 %v31_v12  ;;  %vm210_vm7 = vcmp.ne.s32.totalorder %v1380_v51, 0  ;;  %vm211_vm8 = vcmp.ne.s32.totalorder %v1381_v57, 0  ;;  %v1237_v57 = vld [vmem:[%s1816_s2 + $0x58] sm:$0xff] }
   0xd   :  { %1429 = vmatpush3.msra.mxu0 %v31_v12 }
   0xe   :  { %1346 = vmatmul.mubr.msk.f32.gmra.mxu0 %vm35_vm0, %v22_v10  ;;  %1430 = vmatprep.subr.mxu0 %v28_v13 }
   0xf   :  { %1434 = vmatprep.mubr.msk.f32.mxu0 %vm35_vm0, %v21_v9  ;;  %1431 = vmatpush3.msra.mxu0 %v28_v13 }
  0x10   :  { %1432 = vmatprep.subr.mxu0 %v25_v14 }
  0x11   :  { %1433 = vmatpush3.msra.mxu0 %v25_v14 }
  0x12   :  { %1435 = vmatmul.mubr.msk.f32.vlgmr.msra.gmra.mxu0 %vm35_vm0, %v22_v10  ;;  %1437 = vmatprep.subr.mxu0 %v1580_v4 }
  0x13   :  { %1439 = vmatprep.mubr.msk.f32.mxu0 %vm1581_vm1, %v1580_v4 }
  0xca   :  { %v108_v15 = vpop.f32.mrf.mxu0 }
  0xcb   :  { %213 = vrot.lane.b32.xlu0 %v108_v15, %s1582_s20 }
  0xcc   :  { %v1673_v16 = vpop.f32.mrf.mxu0 }
  0xcd   :  { %547 = vrot.lane.b32.xlu1 %v1673_v16, %s1583_s1  ;;  %1448 = vmatpush3.xpose.msk.msra.mxu1 %vm35_vm0, %v1673_v16 }
  0xce   :  { %1457 = vmatprep.subr.mxu1 %v1580_v4  ;;  %v114_v17 = vpop.f32.mrf.mxu0 }
  0xcf   :  { %380 = vrot.lane.b32.xlu0 %v108_v15, %s1583_s1 }
  0xd0   :  { %v1681_v18 = vpop.f32.mrf.mxu0 }
  0xd1   :  { %545 = vrot.lane.b32.xlu1 %v108_v15, %s1584_s21 }
  0xd2   :  { %v1711_v27 = vpop.f32.mrf.mxu0 }
  0xd3   :  { %721 = vrot.lane.b32.xlu0 %v114_v17, %s1582_s20 }
  0xd4   :  { %v1716_v29 = vpop.f32.mrf.mxu0 }
  0xd5   :  { %887 = vrot.lane.b32.xlu1 %v114_v17, %s1583_s1 }
  0xd7   :  { %1054 = vrot.lane.b32.xlu0 %v1681_v18, %s1583_s1 }
  0xd9   :  { %1052 = vrot.lane.b32.xlu1 %v114_v17, %s1584_s21 }
 0x13d   :  { %v214_v19 = vpop.permute.xlu0 %213 }
 0x13e   :  { %1438 = vmatpush3.xpose.msk.msra.mxu0 %vm35_vm0, %v214_v19 }
 0x13f   :  { %v548_v20 = vpop.permute.xlu1 %547  ;;  %1442 = vmatprep.subr.mxu0 %v1580_v4 }
 0x141   :  { %1440 = vmatmul.mubr.msk.f32.vlgmr.msra.gmra.mxu0 %vm35_vm0, %v108_v15  ;;  %v381_v21 = vpop.permute.xlu0 %380 }
 0x142   :  { %1450 = vmatmul.mubr.msk.f32.vlgmr.msra.gmra.mxu1 %vm35_vm0, %v381_v21  ;;  %1444 = vmatprep.mubr.msk.f32.mxu0 %vm1581_vm1, %v1580_v4 }
 0x143   :  { %1458 = vmatpush3.xpose.msk.msra.mxu1 %vm35_vm0, %v548_v20  ;;  %1459 = vmatprep.mubr.msk.f32.mxu1 %vm1581_vm1, %v1580_v4  ;;  %v546_v22 = vpop.permute.xlu1 %545 }
 0x144   :  { %1467 = vmatprep.subr.mxu1 %v1580_v4 }
 0x145   :  { %v722_v23 = vpop.permute.xlu0 %721 }
 0x146   :  { %1460 = vmatmul.mubr.msk.f32.vlgmr.msra.gmra.mxu1 %vm35_vm0, %v546_v22 }
 0x147   :  { %1468 = vmatpush3.xpose.msk.msra.mxu1 %vm35_vm0, %v722_v23  ;;  %1469 = vmatprep.mubr.msk.f32.mxu1 %vm1581_vm1, %v1580_v4  ;;  %v888_v24 = vpop.permute.xlu1 %887 }
 0x148   :  { %1477 = vmatprep.subr.mxu1 %v1580_v4 }
 0x149   :  { %v1055_v25 = vpop.permute.xlu0 %1054 }
 0x14a   :  { %1470 = vmatmul.mubr.msk.f32.vlgmr.msra.gmra.mxu1 %vm35_vm0, %v114_v17 }
 0x14b   :  { %1478 = vmatpush3.xpose.msk.msra.mxu1 %vm35_vm0, %v1681_v18  ;;  %1479 = vmatprep.mubr.msk.f32.mxu1 %vm1581_vm1, %v1580_v4  ;;  %v1053_v26 = vpop.permute.xlu1 %1052 }
 0x14c   :  { %1487 = vmatprep.subr.mxu1 %v1580_v4 }
 0x14e   :  { %1480 = vmatmul.mubr.msk.f32.vlgmr.msra.gmra.mxu1 %vm35_vm0, %v888_v24 }
 0x14f   :  { %1488 = vmatpush3.xpose.msk.msra.mxu1 %vm35_vm0, %v1055_v25  ;;  %1489 = vmatprep.mubr.msk.f32.mxu1 %vm1581_vm1, %v1580_v4 }
 0x150   :  { %1497 = vmatprep.subr.mxu1 %v1237_v57 }
 0x152   :  { %1490 = vmatmul.mubr.msk.f32.vlgmr.msra.gmra.mxu1 %vm35_vm0, %v1053_v26 }
 0x153   :  { %1498 = vmatpush3.msra.mxu1 %v1237_v57 }
 0x201   :  { %v285_v32 = vpop.f32.mrf.mxu0 }
 0x202   :  { %v289_v33 = vmul.f32 0.17677669, %v285_v32  ;;  %v452_v34 = vpop.f32.mrf.mxu1 }
 0x203   :  { %v456_v36 = vmul.f32 0.17677669, %v452_v34  ;;  %v1441_v37 = vpop.f32.mrf.mxu0 }
 0x204   :  { %v1451_v38 = vpop.f32.mrf.mxu1  ;;  %v290_v39 = vsel %vm206_vm2, %v289_v33, -1e+09 }
 0x205   :  { %v292_v40 = vsel %vm291_vm3, %v290_v39, -inf  ;;  %v457_v41 = vsel %vm207_vm4, %v456_v36, -1e+09 }
 0x206   :  { %v619_v42 = vpop.f32.mrf.mxu1  ;;  %293 = vmax.xlane.f32.xlu0 %v292_v40  ;;  %v458_v43 = vsel %vm291_vm3, %v457_v41, -inf }
 0x207   :  { %v623_v45 = vmul.f32 0.17677669, %v619_v42  ;;  %459 = vmax.xlane.f32.xlu1 %v458_v43 }
 0x208   :  { %v1461_v47 = vpop.f32.mrf.mxu1 }
 0x209   :  { %v624_v48 = vsel %vm208_vm5, %v623_v45, -1e+09 }
 0x20a   :  { %v793_v49 = vpop.f32.mrf.mxu1  ;;  %v625_v50 = vsel %vm291_vm3, %v624_v48, -inf }
 0x20b   :  { %v797_v52 = vmul.f32 0.17677669, %v793_v49  ;;  %626 = vmax.xlane.f32.xlu0 %v625_v50 }
 0x20c   :  { %v1471_v53 = vpop.f32.mrf.mxu1 }
 0x20d   :  { %v798_v54 = vsel %vm209_vm6, %v797_v52, -1e+09 }
 0x20e   :  { %v959_v55 = vpop.f32.mrf.mxu1  ;;  %v799_v56 = vsel %vm291_vm3, %v798_v54, -inf }
 0x20f   :  { %v963_v58 = vmul.f32 0.17677669, %v959_v55  ;;  %800 = vmax.xlane.f32.xlu0 %v799_v56 }
 0x210   :  { %v1481_v59 = vpop.f32.mrf.mxu1 }
 0x211   :  { %v964_v60 = vsel %vm210_vm7, %v963_v58, -1e+09  ;;  %v1236_v58 = vld [vmem:[%s1816_s2 + $0x50] sm:$0xff]  ;;  %v1233_v59 = vld [vmem:[%s1816_s2 + $0x38] sm:$0xff] }
 0x212   :  { %v1126_v61 = vpop.f32.mrf.mxu1  ;;  %v965_v62 = vsel %vm291_vm3, %v964_v60, -inf  ;;  %1499 = vmatprep.subr.mxu1 %v1236_v58 }
 0x213   :  { %v1130_v63 = vmul.f32 0.17677669, %v1126_v61  ;;  %966 = vmax.xlane.f32.xlu1 %v965_v62  ;;  %1500 = vmatpush3.msra.mxu1 %v1236_v58  ;;  %v1231_v61 = vld [vmem:[%s1816_s2 + $0x28] sm:$0xff]  ;;  %v1230_v62 = vld [vmem:[%s1816_s2 + $0x20] sm:$0xff] }
 0x214   :  { %v1491_v0 = vpop.f32.mrf.mxu1 }
 0x215   :  { %v1131_v1 = vsel %vm211_vm8, %v1130_v63, -1e+09  ;;  %v1229_v0 = vld [vmem:[%s1816_s2 + $0x18] sm:$0xff] }
 0x216   :  { %v1132_v2 = vsel %vm291_vm3, %v1131_v1, -inf }
 0x217   :  { %1133 = vmax.xlane.f32.xlu0 %v1132_v2  ;;  %v1228_v2 = vld [vmem:[%s1816_s2 + $0x10] sm:$0xff] }
 0x224   :  { %304 = vrot.lane.b32.xlu1 %v1673_v16, %s1584_s21 }
 0x28f   :  { %v294_v3 = vpop.xlane.xlu0 %293 }
 0x290   :  { %v295_v5 = vsub.f32 %v290_v39, %v294_v3  ;;  %v460_v6 = vpop.xlane.xlu1 %459 }
 0x291   :  { %v461_v7 = vsub.f32 %v457_v41, %v460_v6  ;;  %v1226_v6 = vld [vmem:[%s1816_s2] sm:$0xff] }
 0x292   :  { %v296_v8 = vmul.f32 1.442695, %v295_v5  ;;  %v1227_v5 = vld [vmem:[%s1816_s2 + $0x8] sm:$0xff] }
 0x293   :  { %v462_v9 = vmul.f32 1.442695, %v461_v7 }
 0x294   :  { %1534 = vpow2.f32 %v296_v8  ;;  %v627_v10 = vpop.xlane.xlu0 %626 }
 0x295   :  { %1536 = vpow2.f32 %v462_v9  ;;  %v628_v11 = vsub.f32 %v624_v48, %v627_v10 }
 0x297   :  { %v629_v12 = vmul.f32 1.442695, %v628_v11 }
 0x298   :  { %v801_v13 = vpop.xlane.xlu0 %800 }
 0x299   :  { %1538 = vpow2.f32 %v629_v12  ;;  %v802_v14 = vsub.f32 %v798_v54, %v801_v13 }
 0x29b   :  { %v803_v15 = vmul.f32 1.442695, %v802_v14 }
 0x29c   :  { %v967_v17 = vpop.xlane.xlu1 %966 }
 0x29d   :  { %1540 = vpow2.f32 %v803_v15  ;;  %v968_v19 = vsub.f32 %v964_v60, %v967_v17  ;;  %v1232_v60 = vld [vmem:[%s1816_s2 + $0x30] sm:$0xff] }
 0x29f   :  { %v969_v20 = vmul.f32 1.442695, %v968_v19 }
 0x2a0   :  { %v305_v21 = vpop.permute.xlu1 %304  ;;  %v1134_v22 = vpop.xlane.xlu0 %1133 }
 0x2a1   :  { %v1535_v23 = vpop.eup %1534  ;;  %1542 = vpow2.f32 %v969_v20  ;;  %v1135_v24 = vsub.f32 %v1131_v1, %v1134_v22  ;;  %1443 = vmatpush3.msra.mxu0 %v305_v21 }
 0x2a2   :  { %v1537_v25 = vpop.eup %1536  ;;  %v298_v26 = vsel %vm291_vm3, %v1535_v23, 0.0  ;;  %1452 = vmatprep.subr.mxu0 %v1580_v4 }
 0x2a3   :  { %v1136_v28 = vmul.f32 1.442695, %v1135_v24  ;;  %299 = vadd.xlane.f32.xlu1 %v298_v26  ;;  %v464_v30 = vsel %vm291_vm3, %v1537_v25, 0.0  ;;  %v1367_v26 = vld [vmem:[%s1817_s3] ss:$0 sm:$0xff] }
 0x2a4   :  { %465 = vadd.xlane.f32.xlu0 %v464_v30 }
 0x2a5   :  { %1544 = vpow2.f32 %v1136_v28 }
 0x2a6   :  { %v1539_v31 = vpop.eup %1538 }
 0x2a7   :  { %v631_v32 = vsel %vm291_vm3, %v1539_v31, 0.0 }
 0x2a8   :  { %632 = vadd.xlane.f32.xlu1 %v631_v32 }
 0x2aa   :  { %v1541_v33 = vpop.eup %1540 }
 0x2ab   :  { %v805_v34 = vsel %vm291_vm3, %v1541_v33, 0.0 }
 0x2ac   :  { %806 = vadd.xlane.f32.xlu0 %v805_v34 }
 0x2ae   :  { %v1543_v35 = vpop.eup %1542 }
 0x2af   :  { %v971_v36 = vsel %vm291_vm3, %v1543_v35, 0.0 }
 0x2b0   :  { %972 = vadd.xlane.f32.xlu1 %v971_v36 }
 0x2b2   :  { %v1545_v37 = vpop.eup %1544 }
 0x2b3   :  { %v1138_v38 = vsel %vm291_vm3, %v1545_v37, 0.0 }
 0x2b4   :  { %1139 = vadd.xlane.f32.xlu0 %v1138_v38 }
 0x2c1   :  { %811 = vrot.lane.b32.xlu1 %v1681_v18, %s1584_s21 }
 0x2c5   :  { %976 = vrot.lane.b32.xlu1 %v1681_v18, %s1582_s20 }
 0x2ca   :  { %469 = vrot.lane.b32.xlu0 %v1673_v16, %s1582_s20 }
 0x32c   :  { %v300_v39 = vpop.xlane.xlu1 %299 }
 0x32d   :  { %1546 = vrcp.f32 %v300_v39  ;;  %v466_v40 = vpop.xlane.xlu0 %465 }
 0x32e   :  { %1548 = vrcp.f32 %v466_v40 }
 0x331   :  { %v633_v41 = vpop.xlane.xlu1 %632 }
 0x332   :  { %1550 = vrcp.f32 %v633_v41 }
 0x335   :  { %v807_v42 = vpop.xlane.xlu0 %806 }
 0x336   :  { %1552 = vrcp.f32 %v807_v42 }
 0x339   :  { %v973_v44 = vpop.xlane.xlu1 %972 }
 0x33a   :  { %v1547_v43 = vpop.eup %1546  ;;  %1554 = vrcp.f32 %v973_v44 }
 0x33b   :  { %v302_v45 = vmul.f32 %v1547_v43, %v1535_v23  ;;  %v1549_v47 = vpop.eup %1548 }
 0x33c   :  { %v468_v18 = vmul.f32 %v1549_v47, %v1537_v25 }
 0x33d   :  { %1445 = vmatmul.mubr.msk.f32.vlgmr.msra.gmra.mxu0 %vm291_vm3, %v302_v45  ;;  %v1140_v46 = vpop.xlane.xlu0 %1139  ;;  %v812_v49 = vpop.permute.xlu1 %811 }
 0x33e   :  { %1454 = vmatprep.mubr.msk.f32.mxu0 %vm1581_vm1, %v1580_v4  ;;  %1556 = vrcp.f32 %v1140_v46 }
 0x33f   :  { %v1551_v48 = vpop.eup %1550 }
 0x340   :  { %v635_v50 = vmul.f32 %v1551_v48, %v1539_v31 }
 0x341   :  { %v470_v16 = vpop.permute.xlu0 %469  ;;  %v977_v54 = vpop.permute.xlu1 %976 }
 0x342   :  { %1453 = vmatpush3.msra.mxu0 %v470_v16 }
 0x343   :  { %1455 = vmatmul.mubr.msk.f32.vlgmr.msra.gmra.mxu0 %vm291_vm3, %v468_v18  ;;  %1462 = vmatprep.subr.mxu0 %v1580_v4  ;;  %v1553_v51 = vpop.eup %1552 }
 0x344   :  { %1463 = vmatpush3.msra.mxu0 %v1716_v29  ;;  %1464 = vmatprep.mubr.msk.f32.mxu0 %vm1581_vm1, %v1580_v4  ;;  %v809_v52 = vmul.f32 %v1553_v51, %v1541_v33 }
 0x345   :  { %1472 = vmatprep.subr.mxu0 %v1580_v4 }
 0x347   :  { %1465 = vmatmul.mubr.msk.f32.vlgmr.msra.gmra.mxu0 %vm291_vm3, %v635_v50  ;;  %v1555_v53 = vpop.eup %1554 }
 0x348   :  { %1473 = vmatpush3.msra.mxu0 %v812_v49  ;;  %1474 = vmatprep.mubr.msk.f32.mxu0 %vm1581_vm1, %v1580_v4  ;;  %v975_v29 = vmul.f32 %v1555_v53, %v1543_v35 }
 0x349   :  { %1482 = vmatprep.subr.mxu0 %v1580_v4 }
 0x34b   :  { %1475 = vmatmul.mubr.msk.f32.vlgmr.msra.gmra.mxu0 %vm291_vm3, %v809_v52  ;;  %v1557_v55 = vpop.eup %1556 }
 0x34c   :  { %1483 = vmatpush3.msra.mxu0 %v977_v54  ;;  %1484 = vmatprep.mubr.msk.f32.mxu0 %vm1581_vm1, %v1580_v4  ;;  %v1142_v56 = vmul.f32 %v1557_v55, %v1545_v37 }
 0x34d   :  { %1492 = vmatprep.subr.mxu0 %v1580_v4 }
 0x34f   :  { %1485 = vmatmul.mubr.msk.f32.vlgmr.msra.gmra.mxu0 %vm291_vm3, %v975_v29 }
 0x350   :  { %1493 = vmatpush3.msra.mxu0 %v1711_v27  ;;  %1494 = vmatprep.mubr.msk.f32.mxu0 %vm1581_vm1, %v1580_v4  ;;  %v1235_v27 = vld [vmem:[%s1816_s2 + $0x48] sm:$0xff]  ;;  %v1234_v4 = vld [vmem:[%s1816_s2 + $0x40] sm:$0xff] }
 0x351   :  { %1501 = vmatprep.subr.mxu1 %v1235_v27 }
 0x352   :  { %1502 = vmatpush3.msra.mxu1 %v1235_v27 }
 0x353   :  { %1495 = vmatmul.mubr.msk.f32.vlgmr.msra.gmra.mxu0 %vm291_vm3, %v1142_v56  ;;  %1503 = vmatprep.subr.mxu1 %v1234_v4 }
 0x354   :  { %1504 = vmatpush3.msra.mxu1 %v1234_v4 }
 0x355   :  { %1505 = vmatprep.subr.mxu1 %v1233_v59 }
 0x356   :  { %1506 = vmatpush3.msra.mxu1 %v1233_v59 }
 0x357   :  { %1507 = vmatprep.subr.mxu1 %v1232_v60 }
 0x358   :  { %1508 = vmatpush3.msra.mxu1 %v1232_v60 }
 0x359   :  { %1509 = vmatprep.subr.mxu1 %v1231_v61 }
 0x35a   :  { %1510 = vmatpush3.msra.mxu1 %v1231_v61 }
 0x35b   :  { %1511 = vmatprep.subr.mxu1 %v1230_v62 }
 0x35c   :  { %1512 = vmatpush3.msra.mxu1 %v1230_v62 }
 0x35d   :  { %1513 = vmatprep.subr.mxu1 %v1229_v0 }
 0x35e   :  { %1514 = vmatpush3.msra.mxu1 %v1229_v0 }
 0x35f   :  { %1515 = vmatprep.subr.mxu1 %v1228_v2 }
 0x360   :  { %1516 = vmatpush3.msra.mxu1 %v1228_v2 }
 0x361   :  { %1517 = vmatprep.subr.mxu1 %v1227_v5 }
 0x362   :  { %1518 = vmatpush3.msra.mxu1 %v1227_v5 }
 0x363   :  { %1519 = vmatprep.subr.mxu1 %v1226_v6 }
 0x364   :  { %1520 = vmatpush3.msra.mxu1 %v1226_v6 }
 0x3fd   :  { %v376_v63 = vpop.f32.mrf.mxu0 }
 0x3ff   :  { %v1446_v1 = vpop.f32.mrf.mxu0 }
 0x403   :  { %v541_v3 = vpop.f32.mrf.mxu0 }
 0x404   :  { %710 = vrot.lane.b32.xlu0 %v541_v3, %s1582_s20 }
 0x405   :  { %v1456_v7 = vpop.f32.mrf.mxu0 }
 0x407   :  { %v705_v8 = vpop.f32.mrf.mxu0 }
 0x408   :  { %714 = vrot.lane.b32.xlu1 %v705_v8, %s1584_s21 }
 0x409   :  { %v1466_v9 = vpop.f32.mrf.mxu0 }
 0x40b   :  { %v883_v10 = vpop.f32.mrf.mxu0 }
 0x40d   :  { %v1476_v11 = vpop.f32.mrf.mxu0 }
 0x40f   :  { %v1048_v12 = vpop.f32.mrf.mxu0 }
 0x410   :  { %1217 = vrot.lane.b32.xlu0 %v1048_v12, %s1582_s20 }
 0x411   :  { %v1486_v13 = vpop.f32.mrf.mxu0 }
 0x413   :  { %v1212_v14 = vpop.f32.mrf.mxu0 }
 0x414   :  { %1221 = vrot.lane.b32.xlu1 %v1212_v14, %s1584_s21  ;;  %s1585_s21 = smov [#allocation2]  }
 0x415   :  { %v1496_v15 = vpop.f32.mrf.mxu0  ;;  %s1334_s24 = sshll.u32 %s1585_s21, 4  ;;  %s1335_s24 = int_to_ptr.vmem [resolvable:$true] %s1334_s24 }
 0x416   :  { %s1558_s25 = scalar_lea.vmem %s1335_s24, 256  ;;  %p1563_p1 = scmp.lt.s32.totalorder %s1335_s24, %s1335_s24 }
 0x417   :  { %p1559_p0 = scmp.ne.s32.totalorder %s1335_s24, %s1558_s25  ;;  %p1564_p2 = scmp.lt.s32.totalorder %s1558_s25, %s1558_s25 }
 0x419   :  { %p1565_p3 = por %p1564_p2, %p1563_p1 }
 0x41b   :  { %p1566_p4 = pnand %p1565_p3, %p1559_p0 }
 0x476   :  { %v711_v17 = vpop.permute.xlu0 %710 }
 0x477   :  { %v717_v19 = vsel %vm35_vm0, %v376_v63, %v711_v17 }
 0x47a   :  { %v715_v20 = vpop.permute.xlu1 %714 }
 0x47b   :  { %v719_v21 = vsel %vm718_vm9, %v717_v19, %v715_v20 }
 0x47c   :  { %1521 = vmatprep.mubr.msk.f32.mxu1 %vm1245_vm10, %v719_v21 }
 0x482   :  { %v1218_v22 = vpop.permute.xlu0 %1217 }
 0x483   :  { %v1224_v23 = vsel %vm35_vm0, %v883_v10, %v1218_v22 }
 0x486   :  { %v1222_v24 = vpop.permute.xlu1 %1221 }
 0x487   :  { %v1225_v25 = vsel %vm718_vm9, %v1224_v23, %v1222_v24 }
 0x488   :  { %1522 = vmatmul.mubr.msk.f32.vlgmr.msra.gmra.mxu1 %vm1245_vm10, %v1225_v25 }
 0x548   :  { %v1523_v28 = vpop.f32.mrf.mxu1 }
 0x549   :  { %v1324_v30 = vadd.f32 %v1523_v28, %v1367_v26 }
 0x54a   :  { %v1318_v31 = vpop.f32.mrf.mxu1 }
 0x54b   :  { %1328 = vst.msk [vmem:[#allocation2 + $0x8] sm:$0xff] %vm35_vm0, %v1324_v30  ;;  %v1319_v32 = vadd.f32 %v1367_v26, %v1318_v31 }
 0x54d   :  { %1327 = vst.msk [vmem:[#allocation2] sm:$0xff] %vm35_vm0, %v1319_v32 }
 0x54e   :  { %1569 = shalt.err (!%p1566_p4)
}
 0x54f   :  { %s1586_s4 = smov 128   ;;  %s1587_s3 = smov 8  }
 0x550   :  { %1340 = dma.vmem_to_hbm [thread:$0]  %s1335_s24, 256, %s1819_s5, [#allocation3], %s1586_s4, %s1586_s4, %s1587_s3  }
 0x551   :  { %1578 = dma.done.wait [#allocation3], 256  }
 0x552   :  { %1579 = vsyncadd [#allocation3], 4294967040 }
 0x553   :  { %1344 = vsyncpa [#allocation3], 1 }

</bundles_post_ra>
